<compile_context>
chip_gen: v7x
topology: tpu7x:2x2x1
jax: 0.10.0
libtpu: 0.0.40
codegen_flags: <defaults>
</compile_context>

<pallas_src>
import jax
import jax.numpy as jnp
from jax.experimental import pallas as pl
from jax.experimental.pallas import tpu as pltpu


# --------------------------------------------------------------------------
# Kernel: single-step LSTM (zero initial state, f-gate folded away) + fc4.
# --------------------------------------------------------------------------
def model_kernel(x_ref, wg_ref, bg_ref, w4t_ref, b4_ref, out_ref):
    f32 = jnp.float32
    H = wg_ref.shape[1] // 3

    x = x_ref[...]                                                   # (Bb, D)

    # One fused lane-dense gate matmul: (Bb, D) @ (D, 3H) -> (Bb, 3H)
    gates = jnp.dot(x, wg_ref[...], preferred_element_type=f32) + bg_ref[...]

    i_g = jax.nn.sigmoid(gates[:, 0 * H:1 * H])                      # input gate
    g_g = jnp.tanh(gates[:, 1 * H:2 * H])                            # cell candidate
    o_g = jax.nn.sigmoid(gates[:, 2 * H:3 * H])                      # output gate

    # c0 = 0  =>  c = i * g  (forget gate eliminated, mathematically exact)
    h = o_g * jnp.tanh(i_g * g_g)                                    # (Bb, H)

    # fc4 on the (only) timestep, into a lane-dense padded output block.
    out_ref[...] = jnp.dot(h, w4t_ref[...], preferred_element_type=f32) + b4_ref[...]


# --------------------------------------------------------------------------
# Parameter construction (matches the nn.Module's parameter shapes).
# --------------------------------------------------------------------------
def make_params(key, input_dim, output_dim, hidden_size=64):
    ks = jax.random.split(key, 12)

    def rnd(k, shape):
        return jax.random.normal(k, shape, dtype=jnp.float32) * 0.1

    p = {}
    p["w1"] = rnd(ks[0], (200, input_dim));        p["b1"] = rnd(ks[1], (200,))
    p["w2"] = rnd(ks[2], (100, 200));              p["b2"] = rnd(ks[3], (100,))
    p["w3"] = rnd(ks[4], (input_dim, 100));        p["b3"] = rnd(ks[5], (input_dim,))
    p["w_ih"] = rnd(ks[6], (4 * hidden_size, input_dim))
    p["w_hh"] = rnd(ks[7], (4 * hidden_size, hidden_size))   # unused: h0 = 0
    p["b_ih"] = rnd(ks[8], (4 * hidden_size,))
    p["b_hh"] = rnd(ks[9], (4 * hidden_size,))
    p["w4"] = rnd(ks[10], (output_dim, hidden_size)); p["b4"] = rnd(ks[11], (output_dim,))
    return p


# --------------------------------------------------------------------------
# One-time preprocessing (hoisted out of the per-call path).
# --------------------------------------------------------------------------
def prepare_params(params, hidden_size=64):
    H = hidden_size
    output_dim = params["w4"].shape[0]

    # LSTM input weights, PyTorch gate order (i, f, g, o).  Drop f; keep (i, g, o).
    w_ih_t = params["w_ih"].T                                         # (D, 4H)
    w_gates = jnp.concatenate(
        [w_ih_t[:, 0 * H:1 * H], w_ih_t[:, 2 * H:3 * H], w_ih_t[:, 3 * H:4 * H]],
        axis=1)                                                       # (D, 3H)

    b_full = params["b_ih"] + params["b_hh"]                          # recurrent bias folded
    b_gates = jnp.concatenate(
        [b_full[0 * H:1 * H], b_full[2 * H:3 * H], b_full[3 * H:4 * H]]
    ).reshape(1, 3 * H)                                               # (1, 3H)

    # fc4 weights, transposed and zero-padded to a 128-lane-multiple output.
    out_pad = ((output_dim + 127) // 128) * 128
    w4t = params["w4"].T                                              # (H, out)
    w4t_pad = jnp.zeros((H, out_pad), jnp.float32).at[:, :output_dim].set(w4t)
    b4_pad = jnp.zeros((1, out_pad), jnp.float32).at[:, :output_dim].set(
        params["b4"].reshape(1, -1))

    return {
        "w_gates": w_gates,
        "b_gates": b_gates,
        "w4t_pad": w4t_pad,
        "b4_pad": b4_pad,
        "output_dim": output_dim,
        "out_pad": out_pad,
        "hidden_size": H,
    }


# --------------------------------------------------------------------------
# Forward wrapper.
# --------------------------------------------------------------------------
def model_forward(x, prep):
    B, D = x.shape
    H = prep["hidden_size"]
    out_pad = prep["out_pad"]
    output_dim = prep["output_dim"]

    # Batch tiling: shard large batches across the grid ("parallel" axis).
    block_b = 128 if (B >= 128 and B % 128 == 0) else B
    grid = (B // block_b,)

    out = pl.pallas_call(
        model_kernel,
        out_shape=jax.ShapeDtypeStruct((B, out_pad), jnp.float32),
        grid_spec=pltpu.PrefetchScalarGridSpec(
            num_scalar_prefetch=0,
            grid=grid,
            in_specs=[
                pl.BlockSpec((block_b, D), lambda i: (i, 0)),      # x (batch-blocked)
                pl.BlockSpec((D, 3 * H), lambda i: (0, 0)),        # fused gate weights
                pl.BlockSpec((1, 3 * H), lambda i: (0, 0)),        # fused gate bias
                pl.BlockSpec((H, out_pad), lambda i: (0, 0)),      # fc4 weight (padded)
                pl.BlockSpec((1, out_pad), lambda i: (0, 0)),      # fc4 bias (padded)
            ],
            out_specs=pl.BlockSpec((block_b, out_pad), lambda i: (i, 0)),
        ),
        compiler_params=pltpu.CompilerParams(
            dimension_semantics=("parallel",)),
    )(x, prep["w_gates"], prep["b_gates"], prep["w4t_pad"], prep["b4_pad"])

    return out[:, :output_dim].reshape(B, 1, output_dim)


# --------------------------------------------------------------------------
# Pure-JAX reference mirroring the PyTorch forward (incl. its dead MLP branch).
# --------------------------------------------------------------------------
def reference_forward(x, params, hidden_size=64):
    H = hidden_size
    h1 = jnp.tanh(x @ params["w1"].T + params["b1"])
    h2 = jnp.tanh(h1 @ params["w2"].T + params["b2"])
    _h3 = jnp.tanh(h2 @ params["w3"].T + params["b3"])   # discarded, as in torch
    gates = x @ params["w_ih"].T + params["b_ih"] + params["b_hh"]
    gi, gf, gg, go = (gates[:, 0 * H:1 * H], gates[:, 1 * H:2 * H],
                      gates[:, 2 * H:3 * H], gates[:, 3 * H:4 * H])
    i_g = jax.nn.sigmoid(gi)
    f_g = jax.nn.sigmoid(gf)                              # multiplies c0 = 0
    g_g = jnp.tanh(gg)
    o_g = jax.nn.sigmoid(go)
    c = f_g * 0.0 + i_g * g_g
    h = o_g * jnp.tanh(c)
    out = h @ params["w4"].T + params["b4"]
    return out.reshape(x.shape[0], 1, -1)


if __name__ == "__main__":
    B, input_dim, output_dim, hidden_size = 8, 16, 8, 64

    key = jax.random.PRNGKey(0)
    k_x, k_p = jax.random.split(key)
    x = jax.random.normal(k_x, (B, input_dim), dtype=jnp.float32)
    params = make_params(k_p, input_dim, output_dim, hidden_size)

    prep = prepare_params(params, hidden_size)            # one-time weight prep
    out = model_forward(x, prep)
    out = jax.block_until_ready(out)

    ref = reference_forward(x, params, hidden_size)
    assert out.shape == (B, 1, output_dim), out.shape
    assert jnp.allclose(out, ref, atol=1e-5, rtol=1e-5), \
        f"max abs diff {jnp.max(jnp.abs(out - ref))}"

    print("KERNEL_OK")
</pallas_src>

<mosaic_0001>
module attributes {stable_mosaic.version = 11 : i64} {
  func.func @model_kernel(%arg0: i32, %arg1: memref<8x16xf32, #tpu.memory_space<vmem>>, %arg2: memref<16x192xf32, #tpu.memory_space<vmem>>, %arg3: memref<1x192xf32, #tpu.memory_space<vmem>>, %arg4: memref<64x128xf32, #tpu.memory_space<vmem>>, %arg5: memref<1x128xf32, #tpu.memory_space<vmem>>, %arg6: memref<8x128xf32, #tpu.memory_space<vmem>>) attributes {dimension_semantics = [#tpu.dimension_semantics<parallel>], iteration_bounds = array<i64: 1>, scalar_prefetch = 0 : i64, scratch_operands = 0 : i64, tpu.core_type = #tpu.core_type<tc>, window_params = [{transform_indices = @transform_0, window_bounds = array<i64: 8, 16>}, {pipeline_mode = #tpu.pipeline_mode<synchronous>, transform_indices = @transform_1, window_bounds = array<i64: 16, 192>}, {pipeline_mode = #tpu.pipeline_mode<synchronous>, transform_indices = @transform_2, window_bounds = array<i64: 1, 192>}, {pipeline_mode = #tpu.pipeline_mode<synchronous>, transform_indices = @transform_3, window_bounds = array<i64: 64, 128>}, {pipeline_mode = #tpu.pipeline_mode<synchronous>, transform_indices = @transform_4, window_bounds = array<i64: 1, 128>}, {transform_indices = @transform_5, window_bounds = array<i64: 8, 128>}]} {
    %c0 = arith.constant 0 : index
    %c0_0 = arith.constant 0 : index
    %0 = vector.load %arg1[%c0, %c0_0] : memref<8x16xf32, #tpu.memory_space<vmem>>, vector<8x16xf32>
    %c0_1 = arith.constant 0 : index
    %c0_2 = arith.constant 0 : index
    %1 = vector.load %arg2[%c0_1, %c0_2] : memref<16x192xf32, #tpu.memory_space<vmem>>, vector<16x192xf32>
    %cst = arith.constant dense<0.000000e+00> : vector<8x192xf32>
    %2 = tpu.matmul %0, %1, %cst {dimension_numbers = #tpu.dot_dimension_numbers<[1], [0], [0], [1], [0, 0, 1, 1], [], []>} : vector<8x16xf32>, vector<16x192xf32>, vector<8x192xf32> -> vector<8x192xf32>
    %c0_3 = arith.constant 0 : index
    %c0_4 = arith.constant 0 : index
    %3 = vector.load %arg3[%c0_3, %c0_4] : memref<1x192xf32, #tpu.memory_space<vmem>>, vector<1x192xf32>
    %4 = vector.broadcast %3 : vector<1x192xf32> to vector<8x192xf32>
    %5 = arith.addf %2, %4 : vector<8x192xf32>
    %6 = vector.extract_strided_slice %5 {offsets = [0, 0], sizes = [8, 64], strides = [1, 1]} : vector<8x192xf32> to vector<8x64xf32>
    %7 = arith.negf %6 : vector<8x64xf32>
    %8 = math.exp %7 : vector<8x64xf32>
    %cst_5 = arith.constant 1.000000e+00 : f32
    %9 = vector.broadcast %cst_5 : f32 to vector<8x64xf32>
    %10 = arith.addf %9, %8 : vector<8x64xf32>
    %11 = arith.divf %9, %10 : vector<8x64xf32>
    %12 = vector.extract_strided_slice %5 {offsets = [0, 64], sizes = [8, 64], strides = [1, 1]} : vector<8x192xf32> to vector<8x64xf32>
    %13 = math.tanh %12 : vector<8x64xf32>
    %14 = vector.extract_strided_slice %5 {offsets = [0, 128], sizes = [8, 64], strides = [1, 1]} : vector<8x192xf32> to vector<8x64xf32>
    %15 = arith.negf %14 : vector<8x64xf32>
    %16 = math.exp %15 : vector<8x64xf32>
    %cst_6 = arith.constant 1.000000e+00 : f32
    %17 = vector.broadcast %cst_6 : f32 to vector<8x64xf32>
    %18 = arith.addf %17, %16 : vector<8x64xf32>
    %19 = arith.divf %17, %18 : vector<8x64xf32>
    %20 = arith.mulf %11, %13 : vector<8x64xf32>
    %21 = math.tanh %20 : vector<8x64xf32>
    %22 = arith.mulf %19, %21 : vector<8x64xf32>
    %c0_7 = arith.constant 0 : index
    %c0_8 = arith.constant 0 : index
    %23 = vector.load %arg4[%c0_7, %c0_8] : memref<64x128xf32, #tpu.memory_space<vmem>>, vector<64x128xf32>
    %cst_9 = arith.constant dense<0.000000e+00> : vector<8x128xf32>
    %24 = tpu.matmul %22, %23, %cst_9 {dimension_numbers = #tpu.dot_dimension_numbers<[1], [0], [0], [1], [0, 0, 1, 1], [], []>} : vector<8x64xf32>, vector<64x128xf32>, vector<8x128xf32> -> vector<8x128xf32>
    %c0_10 = arith.constant 0 : index
    %c0_11 = arith.constant 0 : index
    %25 = vector.load %arg5[%c0_10, %c0_11] : memref<1x128xf32, #tpu.memory_space<vmem>>, vector<1x128xf32>
    %26 = vector.broadcast %25 : vector<1x128xf32> to vector<8x128xf32>
    %27 = arith.addf %24, %26 : vector<8x128xf32>
    %c0_12 = arith.constant 0 : index
    %c0_13 = arith.constant 0 : index
    %28 = vector.load %arg6[%c0_12, %c0_13] : memref<8x128xf32, #tpu.memory_space<vmem>>, vector<8x128xf32>
    tpu.vector_store %arg6[%c0_12, %c0_13], %27 {strides = array<i32>} : memref<8x128xf32, #tpu.memory_space<vmem>>, vector<8x128xf32>,
    return
  }
  func.func @transform_0(%arg0: i32) -> (i32, i32) {
    %c0_i32 = arith.constant 0 : i32
    %c0_i32_0 = arith.constant 0 : i32
    return %arg0, %c0_i32 : i32, i32
  }
  func.func @transform_1(%arg0: i32) -> (i32, i32) {
    %c0_i32 = arith.constant 0 : i32
    %c0_i32_0 = arith.constant 0 : i32
    %c0_i32_1 = arith.constant 0 : i32
    return %c0_i32, %c0_i32_0 : i32, i32
  }
  func.func @transform_2(%arg0: i32) -> (i32, i32) {
    %c0_i32 = arith.constant 0 : i32
    %c0_i32_0 = arith.constant 0 : i32
    %c0_i32_1 = arith.constant 0 : i32
    return %c0_i32, %c0_i32_0 : i32, i32
  }
  func.func @transform_3(%arg0: i32) -> (i32, i32) {
    %c0_i32 = arith.constant 0 : i32
    %c0_i32_0 = arith.constant 0 : i32
    %c0_i32_1 = arith.constant 0 : i32
    return %c0_i32, %c0_i32_0 : i32, i32
  }
  func.func @transform_4(%arg0: i32) -> (i32, i32) {
    %c0_i32 = arith.constant 0 : i32
    %c0_i32_0 = arith.constant 0 : i32
    %c0_i32_1 = arith.constant 0 : i32
    return %c0_i32, %c0_i32_0 : i32, i32
  }
  func.func @transform_5(%arg0: i32) -> (i32, i32) {
    %c0_i32 = arith.constant 0 : i32
    %c0_i32_0 = arith.constant 0 : i32
    return %arg0, %c0_i32 : i32, i32
  }
}

</mosaic_0001>

<bundles_post_ra>
// kernel: tpu_custom_call.1
= control target key start
LH: loop header
LB: loop body
LE: loop exit
PB: predicated region body
PF: predicated region fallthrough
CT: control target
= control target key end

     0   :  { %10 = vsyncpa [#allocation3], 0  ;;  %s541_s0 = inlined_call_operand.hbm [shape: f32[8,16], index: 0, kind: input, shape index: {}]   ;;  %s542_s1 = inlined_call_operand.hbm [shape: f32[16,192], index: 1, kind: input, shape index: {}]   ;;  %s543_s2 = inlined_call_operand.vmem [shape: f32[1,192], index: 2, kind: input, shape index: {}]   ;;  %s544_s3 = inlined_call_operand.hbm [shape: f32[64,128], index: 3, kind: input, shape index: {}]   ;;  %s545_s4 = inlined_call_operand.vmem [shape: f32[1,128], index: 4, kind: input, shape index: {}]   ;;  %s546_s5 = inlined_call_operand.hbm [shape: f32[8,128], index: 5, kind: output, shape index: {}]  }
   0x1   :  { %11 = vsyncpa [#allocation6], 0 }
   0x2   :  { %12 = vsyncpa [#allocation4], 0  ;;  %s445_s18 = smov [#allocation5]   ;;  %s351_s22 = scalar_lea.hbm %s542_s1, 512 }
   0x3   :  { %s28_s19 = sshll.u32 %s445_s18, 4  ;;  %p352_p0 = scmp.ne.s32.totalorder %s542_s1, %s351_s22  ;;  %s29_s19 = int_to_ptr.vmem [resolvable:$true] %s28_s19 }
   0x4   :  { %p355_p1 = scmp.lt.u32.totalorder %s351_s22, %s542_s1 }
   0x6   :  { %p357_p2 = pnand %p355_p1, %p352_p0 }
   0x8   :  { %360 = shalt.err (!%p357_p2)
}
   0x9   :  { %s361_s27 = scalar_lea.vmem %s29_s19, 512  ;;  %p366_p4 = scmp.lt.s32.totalorder %s29_s19, %s29_s19 }
   0xa   :  { %p362_p3 = scmp.ne.s32.totalorder %s29_s19, %s361_s27  ;;  %p367_p5 = scmp.lt.s32.totalorder %s361_s27, %s361_s27 }
   0xc   :  { %p368_p6 = por %p367_p5, %p366_p4 }
   0xe   :  { %p369_p7 = pnand %p368_p6, %p362_p3 }
  0x10   :  { %372 = shalt.err (!%p369_p7)
}
  0x11   :  { %s446_s28 = smov 256   ;;  %s447_s29 = smov 16  }
  0x12   :  { %34 = dma.hbm_to_vmem [thread:$0]  %s542_s1, 512, %s29_s19, [#allocation6], %s446_s28, %s446_s28, %s447_s29  }
  0x13   :  { %s448_s7 = smov [#allocation2]   ;;  %s449_s9 = smov [#allocation7]  }
  0x14   :  { %s19_s8 = sshll.u32 %s448_s7, 4  ;;  %s42_s10 = sshll.u32 %s449_s9, 4  ;;  %s20_s8 = int_to_ptr.vmem [resolvable:$true] %s19_s8  ;;  %s43_s10 = int_to_ptr.vmem [resolvable:$true] %s42_s10 }
  0x15   :  { %s373_s13 = scalar_lea.hbm %s541_s0, 128 }
  0x16   :  { %p374_p8 = scmp.ne.s32.totalorder %s541_s0, %s373_s13  ;;  %p377_p9 = scmp.lt.u32.totalorder %s373_s13, %s541_s0 }
  0x18   :  { %p379_p10 = pnand %p377_p9, %p374_p8 }
  0x1a   :  { %382 = shalt.err (!%p379_p10)
}
  0x1b   :  { %s383_s1 = scalar_lea.vmem %s20_s8, 128  ;;  %p388_p12 = scmp.lt.s32.totalorder %s20_s8, %s20_s8 }
  0x1c   :  { %p384_p11 = scmp.ne.s32.totalorder %s20_s8, %s383_s1  ;;  %p389_p13 = scmp.lt.s32.totalorder %s383_s1, %s383_s1 }
  0x1e   :  { %p390_p0 = por %p389_p13, %p388_p12 }
  0x20   :  { %p391_p1 = pnand %p390_p0, %p384_p11 }
  0x22   :  { %394 = shalt.err (!%p391_p1)
}
  0x23   :  { %22 = dma.hbm_to_vmem [thread:$0]  %s541_s0, 128, %s20_s8, [#allocation3]  }
  0x24   :  { %s395_s22 = scalar_lea.hbm %s544_s3, 1024 }
  0x25   :  { %p396_p2 = scmp.ne.s32.totalorder %s544_s3, %s395_s22  ;;  %p399_p3 = scmp.lt.u32.totalorder %s395_s22, %s544_s3 }
  0x27   :  { %p401_p4 = pnand %p399_p3, %p396_p2 }
  0x29   :  { %404 = shalt.err (!%p401_p4)
}
  0x2a   :  { %s405_s27 = scalar_lea.vmem %s43_s10, 1024  ;;  %p410_p6 = scmp.lt.s32.totalorder %s43_s10, %s43_s10 }
  0x2b   :  { %p406_p5 = scmp.ne.s32.totalorder %s43_s10, %s405_s27  ;;  %p411_p7 = scmp.lt.s32.totalorder %s405_s27, %s405_s27 }
  0x2d   :  { %p412_p8 = por %p411_p7, %p410_p6 }
  0x2f   :  { %p413_p9 = pnand %p412_p8, %p406_p5 }
  0x31   :  { %416 = shalt.err (!%p413_p9)
}
  0x32   :  { %s450_s0 = smov 128   ;;  %s451_s28 = smov 8  }
  0x33   :  { %48 = dma.hbm_to_vmem [thread:$0]  %s544_s3, 1024, %s43_s10, [#allocation6], %s450_s0, %s450_s0, %s451_s28  }
  0x34   :  { %439 = dma.done.wait [#allocation3], 128  }
  0x35   :  { %440 = vsyncadd [#allocation3], 4294967168 }
  0x36   :  { %441 = dma.done.wait [#allocation6], 1536  }
  0x37   :  { %442 = vsyncadd [#allocation6], 4294965760  ;;  %v452_v0 = vmov 0.0   ;;  %v62_v1 = vld [vmem:[#allocation5 + $0x8] sm:$0xff]  ;;  %v64_v2 = vld [vmem:[#allocation5 + $0x18] sm:$0xff]  ;;  %vm77_vm0 = vcmask 130048   ;;  %v67_v8 = vlaneseq }
  0x38   :  { %145 = vmatprep.mubr.f32.mxu0 %v452_v0  ;;  %v61_v3 = vld [vmem:[#allocation5] sm:$0xff]  ;;  %v311_v4 = vpack.c.bf16 %v64_v2, %v62_v1  ;;  %v63_v5 = vld [vmem:[#allocation5 + $0x10] sm:$0xff]  ;;  %v60_v7 = vld [vmem:[#allocation2] sm:$0xff]  ;;  %v453_v17 = vmov 0.0|0.0   ;;  %vm454_vm1 = vmmov 0   ;;  %vm187_vm2 = vcmask 523264  }
  0x39   :  { %v313_v6 = vpack.c.bf16 %v63_v5, %v61_v3  ;;  %v68_v9 = vshrl.u32 %v67_v8, 7  ;;  %v65_v11 = vld [vmem:[%s543_s2] sm:$0x3]  ;;  %v172_v13 = vld [vmem:[#allocation7] sm:$0xff]  ;;  %v173_v14 = vld [vmem:[#allocation7 + $0x8] sm:$0xff]  ;;  %315 = vmatprep.subr.bf16.mxu1 %v453_v17  ;;  %308 = vmatprep.mubr.msk.f32.mxu1 %vm454_vm1, %v452_v0  ;;  %s455_s2 = smov 64  }
  0x3a   :  { %312 = vmatprep.subr.bf16.mxu0 %v311_v4  ;;  %v316_v15 = vpack.c.bf16 %v173_v14, %v172_v13  ;;  %v174_v20 = vld [vmem:[#allocation7 + $0x10] sm:$0xff]  ;;  %v175_v21 = vld [vmem:[#allocation7 + $0x18] sm:$0xff]  ;;  %v176_v23 = vld [vmem:[#allocation7 + $0x20] sm:$0xff]  ;;  %s456_s9 = smov [#allocation8]  }
  0x3b   :  { %314 = vmatpush1.bf16.msra.mxu0 %v313_v6  ;;  %v69_v10 = vsub.s32 0, %v68_v9  ;;  %v319_v22 = vpack.c.bf16 %v175_v21, %v174_v20  ;;  %v177_v24 = vld [vmem:[#allocation7 + $0x28] sm:$0xff]  ;;  %v178_v26 = vld [vmem:[#allocation7 + $0x30] sm:$0xff]  ;;  %v179_v27 = vld [vmem:[#allocation7 + $0x38] sm:$0xff]  ;;  %v73_v31 = vsub.s32 1, %v68_v9  ;;  %s268_s10 = sshll.u32 %s456_s9, 4  ;;  %s269_s10 = int_to_ptr.vmem [resolvable:$true] %s268_s10 }
  0x3c   :  { %317 = vmatpush3.bf16.msra.mxu1 %v316_v15  ;;  %v322_v25 = vpack.c.bf16 %v177_v24, %v176_v23  ;;  %v325_v28 = vpack.c.bf16 %v179_v27, %v178_v26  ;;  %v281_v45 = vld [vmem:[%s545_s4] ss:$0 sm:$0xff]  ;;  %s417_s11 = scalar_lea.vmem %s269_s10, 128  ;;  %p422_p11 = scmp.lt.s32.totalorder %s269_s10, %s269_s10 }
  0x3d   :  { %v70_v12 = vrot.slane %v65_v11, %v69_v10  ;;  %318 = vmatprep.subr.bf16.mxu1 %v453_v17  ;;  %v74_v32 = vrot.slane %v65_v11, %v73_v31  ;;  %p418_p10 = scmp.ne.s32.totalorder %s269_s10, %s417_s11  ;;  %p423_p12 = scmp.lt.s32.totalorder %s417_s11, %s417_s11 }
  0x3e   :  { %278 = vmatmul.mubr.msk.f32.vlgmr.msra.gmra.mrb[0].mxu0 %vm77_vm0, %v60_v7 }
  0x3f   :  { %p424_p13 = por %p423_p12, %p422_p11 }
  0x40   :  { %320 = vmatpush3.bf16.msra.mxu1 %v319_v22 }
  0x41   :  { %321 = vmatprep.subr.bf16.mxu1 %v453_v17  ;;  %p425_p0 = pnand %p424_p13, %p418_p10 }
  0x44   :  { %323 = vmatpush3.bf16.msra.mxu1 %v322_v25 }
  0x45   :  { %324 = vmatprep.subr.bf16.mxu1 %v453_v17 }
  0x48   :  { %326 = vmatpush3.bf16.msra.mxu1 %v325_v28 }
 0x111   :  { %v147_v16 = vpop.f32.mrb[0].mxu0 }
 0x112   :  { %v148_v18 = vadd.f32 %v147_v16, %v70_v12  ;;  %v149_v19 = vpop.f32.mrb[1].mxu0 }
 0x113   :  { %v150_v33 = vadd.f32 %v149_v19, %v74_v32 }
 0x114   :  { %339 = vtanh.f32 %v148_v18  ;;  %v279_v30 = vmul.f32 -1.442695, %v148_v18 }
 0x115   :  { %v280_v34 = vmul.f32 -1.442695, %v150_v33 }
 0x116   :  { %341 = vpow2.f32 %v279_v30 }
 0x117   :  { %343 = vpow2.f32 %v280_v34 }
 0x11e   :  { %v340_v29 = vpop.eup %339 }
 0x11f   :  { %166 = vrot.lane.b32.xlu0 %v340_v29, %s455_s2 }
 0x120   :  { %v342_v35 = vpop.eup %341 }
 0x121   :  { %v155_v36 = vadd.f32 1.0, %v342_v35  ;;  %v344_v37 = vpop.eup %343 }
 0x122   :  { %v162_v38 = vadd.f32 1.0, %v344_v37 }
 0x123   :  { %345 = vrcp.f32 %v155_v36 }
 0x124   :  { %347 = vrcp.f32 %v162_v38 }
 0x12d   :  { %v346_v39 = vpop.eup %345 }
 0x12e   :  { %v348_v42 = vpop.eup %347 }
 0x191   :  { %v167_v40 = vpop.permute.xlu0 %166 }
 0x192   :  { %v169_v41 = vmul.f32 %v346_v39, %v167_v40 }
 0x194   :  { %349 = vtanh.f32 %v169_v41 }
 0x19e   :  { %v350_v43 = vpop.eup %349 }
 0x19f   :  { %v171_v44 = vmul.f32 %v350_v43, %v348_v42 }
 0x1a1   :  { %309 = vmatmul.mubr.msk.f32.vlgmr.msra.gmra.mrb[0].mxu1 %vm187_vm2, %v171_v44 }
 0x274   :  { %v257_v46 = vpop.f32.mrb[0].mxu1 }
 0x275   :  { %v258_v47 = vadd.f32 %v281_v45, %v257_v46  ;;  %v310_v48 = vpop.f32.mrb[1].mxu1 }
 0x277   :  { %261 = vst [vmem:[#allocation8] sm:$0xff] %v258_v47 }
 0x278   :  { %428 = shalt.err (!%p425_p0)
}
 0x279   :  { %s429_s14 = scalar_lea.hbm %s546_s5, 128 }
 0x27a   :  { %p430_p1 = scmp.ne.s32.totalorder %s546_s5, %s429_s14  ;;  %p433_p2 = scmp.lt.u32.totalorder %s429_s14, %s546_s5 }
 0x27c   :  { %p435_p3 = pnand %p433_p2, %p430_p1 }
 0x27e   :  { %438 = shalt.err (!%p435_p3)
}
 0x27f   :  { %271 = dma.vmem_to_hbm [thread:$0]  %s269_s10, 128, %s546_s5, [#allocation4]  }
 0x280   :  { %443 = dma.done.wait [#allocation4], 128  }
 0x281   :  { %444 = vsyncadd [#allocation4], 4294967168 }
 0x282   :  { %275 = vsyncpa [#allocation3], 1 }
 0x283   :  { %276 = vsyncpa [#allocation6], 1 }
 0x284   :  { %277 = vsyncpa [#allocation4], 1 }

</bundles_post_ra>
